<compile_context>
chip_gen: v5e
topology: v5e:2x2
jax: 0.10.0
libtpu: 0.0.40
codegen_flags: <defaults>
</compile_context>

<pallas_src>
import numpy as np
import jax
import jax.numpy as jnp
from jax.experimental import pallas as pl
from jax.experimental.pallas import tpu as pltpu

# ---------------- model hyper-params (small, synthetic) ----------------
CIN = 3                        # input image channels (N, 3, H, W)
H = W = 16                     # input spatial size
PATCH = 4                      # patch size of the synthetic backbone
HP, WP = H // PATCH, W // PATCH
TOK = HP * WP                  # tokens per image
DP = CIN * PATCH * PATCH       # patch feature dim (48)
EMBED = 32                     # backbone embedding dim
HIDDEN = 64                    # MLP hidden dim
MIN_DEPTH = 0.001
MAX_DEPTH = 10.0
ALIGN_CORNERS = False

IMG_PER_BLOCK = 8                        # images packed per grid step
LANES = IMG_PER_BLOCK * TOK              # 128 lanes per block
STACK_ROWS = ((HIDDEN + 1 + 7) // 8) * 8  # up-proj rows + skip row, padded to 72


# ---------------- fused kernel: backbone + head + clamp + resize ----------------
def _fused_depth_kernel(xT_ref, wstackT_ref, bstack_ref, w2hT_ref, bfold_ref,
                        maskB_ref, kexp_ref, out_ref):
    # xT: patch features on sublanes, (image, token) flattened on 128 lanes.
    xT = xT_ref[0]                                                        # (DP, L) bf16
    # ONE MXU op for both the MLP up-projection (rows 0:HIDDEN) and the folded
    # patch-embed->head skip path (row HIDDEN); f32 accumulation.
    s = jnp.dot(wstackT_ref[...], xT,
                preferred_element_type=jnp.float32) + bstack_ref[...]     # (72, L)
    aT = s[:HIDDEN, :]                                                    # (HIDDEN, L)
    skipT = s[HIDDEN:HIDDEN + 1, :]                                       # (1, L)
    gT = jax.nn.gelu(aT, approximate=True)     # f32 elementwise (v5e-friendly)
    # folded residual + 1x1-conv decode head
    dT = (skipT
          + jnp.dot(w2hT_ref[...], gT.astype(jnp.bfloat16),
                    preferred_element_type=jnp.float32)
          + bfold_ref[...])                                               # (1, L)
    # encode_decode: clamp BEFORE rescale (matches the torch module's ordering);
    # the head's ReLU is subsumed by min=0.001.
    dT = jnp.clip(dT, MIN_DEPTH, MAX_DEPTH)
    # Lane -> sublane unpack via the precomputed block mask (VPU mul, no in-kernel
    # reshape), fused with the bilinear resize as one (B, L) @ (L, H*W) matmul.
    d_rows = maskB_ref[...] * dT                                          # (B, L)
    out_ref[...] = jnp.dot(d_rows, kexp_ref[...],
                           preferred_element_type=jnp.float32)            # (B, 256)


def _run_fused(xT, wstackT, bstackc, w2hT, bfold, maskB, kexp):
    nblk = xT.shape[0]
    full = lambda a: pl.BlockSpec(a.shape, lambda n: (0,) * a.ndim)  # resident weights
    return pl.pallas_call(
        _fused_depth_kernel,
        out_shape=jax.ShapeDtypeStruct((nblk * IMG_PER_BLOCK, H * W), jnp.float32),
        grid=(nblk,),
        in_specs=[
            pl.BlockSpec((1, DP, LANES), lambda n: (n, 0, 0)),
            full(wstackT), full(bstackc), full(w2hT), full(bfold),
            full(maskB), full(kexp),
        ],
        out_specs=pl.BlockSpec((IMG_PER_BLOCK, H * W), lambda n: (n, 0)),
        compiler_params=pltpu.CompilerParams(
            dimension_semantics=("parallel",)),   # block-per-core on v7x megacore
    )(xT, wstackT, bstackc, w2hT, bfold, maskB, kexp)


# ---------------- host-side glue: params, folding, patchify, resize constants ----------------
def init_params(key):
    ks = jax.random.split(key, 5)
    scale = lambda fan_in: 1.0 / np.sqrt(fan_in)
    return {
        "w_emb": jax.random.normal(ks[0], (DP, EMBED), jnp.float32) * scale(DP),
        "b_emb": jnp.zeros((1, EMBED), jnp.float32),
        "w1": jax.random.normal(ks[1], (EMBED, HIDDEN), jnp.float32) * scale(EMBED),
        "b1": jnp.zeros((1, HIDDEN), jnp.float32),
        "w2": jax.random.normal(ks[2], (HIDDEN, EMBED), jnp.float32) * scale(HIDDEN),
        "b2": jnp.zeros((1, EMBED), jnp.float32),
        "w_head": jax.random.normal(ks[3], (EMBED, 1), jnp.float32) * scale(EMBED),
        "b_head": jnp.full((1, 1), 0.1, jnp.float32),
    }


def fold_params(params):
    """Fold the patch embedding into the MLP up-projection / skip / head weights,
    transpose for tokens-on-lanes layout, and cast MXU operands to bf16.

      d = x @ (w_emb w_head) + gelu(x @ (w_emb w1) + b_up) @ (w2 w_head) + b_fold
    """
    w_up = params["w_emb"] @ params["w1"]                                   # (DP, HIDDEN)
    b_up = params["b_emb"] @ params["w1"] + params["b1"]                    # (1, HIDDEN)
    w_skip = params["w_emb"] @ params["w_head"]                             # (DP, 1)
    w2h = params["w2"] @ params["w_head"]                                   # (HIDDEN, 1)
    b_fold = (params["b_emb"] + params["b2"]) @ params["w_head"] + params["b_head"]
    pad = STACK_ROWS - HIDDEN - 1
    wstackT = jnp.concatenate(
        [w_up.T, w_skip.T, jnp.zeros((pad, DP), jnp.float32)], axis=0)      # (72, DP)
    bstackc = jnp.concatenate(
        [b_up.T, jnp.zeros((pad + 1, 1), jnp.float32)], axis=0)             # (72, 1)
    return {
        "wstackT": wstackT.astype(jnp.bfloat16),
        "bstackc": bstackc,                          # f32
        "w2hT": w2h.T.astype(jnp.bfloat16),          # (1, HIDDEN)
        "bfold": b_fold,                             # (1, 1) f32
    }


def _bilinear_matrix(out_size, in_size, align_corners):
    # Matches torch F.interpolate(mode='bilinear') coordinate transform.
    dst = np.arange(out_size, dtype=np.float64)
    if align_corners and out_size > 1:
        src = dst * (in_size - 1) / (out_size - 1)
    else:
        src = (dst + 0.5) * (in_size / out_size) - 0.5
        src = np.maximum(src, 0.0)
    i0 = np.clip(np.floor(src).astype(np.int64), 0, in_size - 1)
    i1 = np.minimum(i0 + 1, in_size - 1)
    w1 = src - i0
    w0 = 1.0 - w1
    A = np.zeros((out_size, in_size), dtype=np.float64)
    A[np.arange(out_size), i0] += w0
    A[np.arange(out_size), i1] += w1
    return A


def make_resize_constants(n_img_per_block):
    a_h = _bilinear_matrix(H, HP, ALIGN_CORNERS)                   # (16, 4)
    a_w = _bilinear_matrix(W, WP, ALIGN_CORNERS)                   # (16, 4)
    kT = np.kron(a_h, a_w).T                                       # (TOK, H*W)
    kexp = np.tile(kT, (n_img_per_block, 1)).astype(np.float32)    # (B*TOK, H*W)
    # maskB[b, l] = 1 iff lane l belongs to image b of the block.
    maskB = np.kron(np.eye(n_img_per_block), np.ones((1, TOK))).astype(np.float32)
    return (jnp.asarray(a_h.astype(np.float32)), jnp.asarray(a_w.astype(np.float32)),
            jnp.asarray(maskB), jnp.asarray(kexp))


def _patchify_blocks(img):
    """NCHW -> (N/B, DP, B*TOK): per block, B images' tokens concatenated on lanes;
    patch features (c, py, px) on sublanes."""
    N = img.shape[0]
    x = img.reshape(N, CIN, HP, PATCH, WP, PATCH)
    x = jnp.transpose(x, (0, 1, 3, 5, 2, 4))                 # (N, C, Py, Px, HP, WP)
    x = x.reshape(N // IMG_PER_BLOCK, IMG_PER_BLOCK, DP, TOK)
    x = jnp.transpose(x, (0, 2, 1, 3))                        # (N/B, DP, B, TOK)
    return x.reshape(N // IMG_PER_BLOCK, DP, IMG_PER_BLOCK * TOK)


@jax.jit
def depth_encoder_decoder_forward(img, folded, maskB, kexp):
    """whole_inference: backbone -> decode head -> clamp -> bilinear rescale (NCHW out)."""
    N = img.shape[0]
    pad = (-N) % IMG_PER_BLOCK
    if pad:
        img = jnp.concatenate(
            [img, jnp.zeros((pad,) + img.shape[1:], img.dtype)], axis=0)
    xT = _patchify_blocks(img).astype(jnp.bfloat16)           # (N/B, DP, B*TOK)
    out = _run_fused(xT, folded["wstackT"], folded["bstackc"], folded["w2hT"],
                     folded["bfold"], maskB, kexp)            # (N_pad, H*W)
    return out[:N].reshape(N, 1, H, W)                        # NCHW, like torch


# ---------------- pure-JAX reference (un-fused / un-folded, f32) ----------------
def _reference_forward(img, params, a_h, a_w):
    N = img.shape[0]
    x = img.reshape(N, CIN, HP, PATCH, WP, PATCH)
    x = jnp.transpose(x, (0, 2, 4, 1, 3, 5)).reshape(N, TOK, DP)
    h = x @ params["w_emb"] + params["b_emb"]
    m = jax.nn.gelu(h @ params["w1"] + params["b1"], approximate=True)
    m = m @ params["w2"] + params["b2"]
    feat = h + m
    d = feat @ params["w_head"] + params["b_head"]
    d = jnp.maximum(d, 0.0)                                   # head ReLU
    d = jnp.clip(d, MIN_DEPTH, MAX_DEPTH)                     # encode_decode clamp
    d_lr = d.reshape(N, HP, WP)
    hr = jnp.einsum("hi,nij,wj->nhw", a_h, d_lr, a_w)         # bilinear rescale
    return hr[:, None]


if __name__ == "__main__":
    key = jax.random.PRNGKey(0)
    k_img, k_par = jax.random.split(key)
    N = 16                                                     # 2 blocks of 8 images
    img = jax.random.normal(k_img, (N, CIN, H, W), jnp.float32)
    params = init_params(k_par)
    folded = fold_params(params)
    a_h, a_w, maskB, kexp = make_resize_constants(IMG_PER_BLOCK)

    out = depth_encoder_decoder_forward(img, folded, maskB, kexp)
    out = jax.block_until_ready(out)

    assert out.shape == (N, 1, H, W), out.shape
    assert bool(jnp.all(out >= MIN_DEPTH - 1e-5)) and bool(jnp.all(out <= MAX_DEPTH + 1e-5))

    ref = _reference_forward(img, params, a_h, a_w)
    # Kernel uses bf16 MXU operands (f32 accumulation) + host-folded weights, so
    # compare loosely vs the f32 un-folded reference.
    max_err = float(jnp.max(jnp.abs(out - ref)))
    assert bool(jnp.allclose(out, ref, rtol=5e-2, atol=5e-2)), max_err

    # TODO(synk): slide_inference / flip TTA / aug_test averaging / training losses are
    # host-side orchestration around encode_decode and are not part of the kernel.
    print("KERNEL_OK")
</pallas_src>

<mosaic_0001>
module attributes {stable_mosaic.version = 11 : i64} {
  func.func @_fused_depth_kernel(%arg0: i32, %arg1: memref<1x48x128xbf16, #tpu.memory_space<vmem>>, %arg2: memref<72x48xbf16, #tpu.memory_space<vmem>>, %arg3: memref<72x1xf32, #tpu.memory_space<vmem>>, %arg4: memref<1x64xbf16, #tpu.memory_space<vmem>>, %arg5: memref<1x1xf32, #tpu.memory_space<vmem>>, %arg6: memref<8x128xf32, #tpu.memory_space<vmem>>, %arg7: memref<128x256xf32, #tpu.memory_space<vmem>>, %arg8: memref<8x256xf32, #tpu.memory_space<vmem>>) attributes {dimension_semantics = [#tpu.dimension_semantics<parallel>], iteration_bounds = array<i64: 2>, scalar_prefetch = 0 : i64, scratch_operands = 0 : i64, tpu.core_type = #tpu.core_type<tc>, window_params = [{transform_indices = @transform_0, window_bounds = array<i64: 1, 48, 128>}, {pipeline_mode = #tpu.pipeline_mode<synchronous>, transform_indices = @transform_1, window_bounds = array<i64: 72, 48>}, {pipeline_mode = #tpu.pipeline_mode<synchronous>, transform_indices = @transform_2, window_bounds = array<i64: 72, 1>}, {pipeline_mode = #tpu.pipeline_mode<synchronous>, transform_indices = @transform_3, window_bounds = array<i64: 1, 64>}, {pipeline_mode = #tpu.pipeline_mode<synchronous>, transform_indices = @transform_4, window_bounds = array<i64: 1, 1>}, {pipeline_mode = #tpu.pipeline_mode<synchronous>, transform_indices = @transform_5, window_bounds = array<i64: 8, 128>}, {pipeline_mode = #tpu.pipeline_mode<synchronous>, transform_indices = @transform_6, window_bounds = array<i64: 128, 256>}, {transform_indices = @transform_7, window_bounds = array<i64: 8, 256>}]} {
    %c0 = arith.constant 0 : index
    %c0_0 = arith.constant 0 : index
    %c0_1 = arith.constant 0 : index
    %0 = vector.load %arg1[%c0, %c0_0, %c0_1] : memref<1x48x128xbf16, #tpu.memory_space<vmem>>, vector<1x48x128xbf16>
    %1 = vector.shape_cast %0 : vector<1x48x128xbf16> to vector<48x128xbf16>
    %c0_2 = arith.constant 0 : index
    %c0_3 = arith.constant 0 : index
    %2 = vector.load %arg2[%c0_2, %c0_3] : memref<72x48xbf16, #tpu.memory_space<vmem>>, vector<72x48xbf16>
    %cst = arith.constant dense<0.000000e+00> : vector<72x128xf32>
    %3 = tpu.matmul %2, %1, %cst {dimension_numbers = #tpu.dot_dimension_numbers<[1], [0], [0], [1], [0, 0, 1, 1], [], []>} : vector<72x48xbf16>, vector<48x128xbf16>, vector<72x128xf32> -> vector<72x128xf32>
    %c0_4 = arith.constant 0 : index
    %c0_5 = arith.constant 0 : index
    %4 = vector.load %arg3[%c0_4, %c0_5] : memref<72x1xf32, #tpu.memory_space<vmem>>, vector<72x1xf32>
    %5 = vector.broadcast %4 : vector<72x1xf32> to vector<72x128xf32>
    %6 = arith.addf %3, %5 : vector<72x128xf32>
    %7 = vector.extract_strided_slice %6 {offsets = [0, 0], sizes = [64, 128], strides = [1, 1]} : vector<72x128xf32> to vector<64x128xf32>
    %8 = vector.extract_strided_slice %6 {offsets = [64, 0], sizes = [1, 128], strides = [1, 1]} : vector<72x128xf32> to vector<1x128xf32>
    %9 = arith.mulf %7, %7 : vector<64x128xf32>
    %10 = arith.mulf %7, %9 : vector<64x128xf32>
    %cst_6 = arith.constant 4.471500e-02 : f32
    %11 = vector.broadcast %cst_6 : f32 to vector<64x128xf32>
    %12 = arith.mulf %11, %10 : vector<64x128xf32>
    %13 = arith.addf %7, %12 : vector<64x128xf32>
    %cst_7 = arith.constant 0.797884583 : f32
    %14 = vector.broadcast %cst_7 : f32 to vector<64x128xf32>
    %15 = arith.mulf %14, %13 : vector<64x128xf32>
    %16 = math.tanh %15 : vector<64x128xf32>
    %cst_8 = arith.constant 1.000000e+00 : f32
    %17 = vector.broadcast %cst_8 : f32 to vector<64x128xf32>
    %18 = arith.addf %17, %16 : vector<64x128xf32>
    %cst_9 = arith.constant 5.000000e-01 : f32
    %19 = vector.broadcast %cst_9 : f32 to vector<64x128xf32>
    %20 = arith.mulf %19, %18 : vector<64x128xf32>
    %21 = arith.mulf %7, %20 : vector<64x128xf32>
    %c0_10 = arith.constant 0 : index
    %c0_11 = arith.constant 0 : index
    %22 = vector.load %arg4[%c0_10, %c0_11] : memref<1x64xbf16, #tpu.memory_space<vmem>>, vector<1x64xbf16>
    %23 = arith.truncf %21 : vector<64x128xf32> to vector<64x128xbf16>
    %cst_12 = arith.constant dense<0.000000e+00> : vector<1x128xf32>
    %24 = tpu.matmul %22, %23, %cst_12 {dimension_numbers = #tpu.dot_dimension_numbers<[1], [0], [0], [1], [0, 0, 1, 1], [], []>} : vector<1x64xbf16>, vector<64x128xbf16>, vector<1x128xf32> -> vector<1x128xf32>
    %25 = arith.addf %8, %24 : vector<1x128xf32>
    %c0_13 = arith.constant 0 : index
    %c0_14 = arith.constant 0 : index
    %26 = vector.load %arg5[%c0_13, %c0_14] : memref<1x1xf32, #tpu.memory_space<vmem>>, vector<1x1xf32>
    %27 = vector.broadcast %26 : vector<1x1xf32> to vector<1x128xf32>
    %28 = arith.addf %25, %27 : vector<1x128xf32>
    %cst_15 = arith.constant 1.000000e-03 : f32
    %cst_16 = arith.constant 1.000000e+01 : f32
    %29 = vector.broadcast %cst_15 : f32 to vector<1x128xf32>
    %30 = arith.maximumf %29, %28 : vector<1x128xf32>
    %31 = vector.broadcast %cst_16 : f32 to vector<1x128xf32>
    %32 = arith.minimumf %31, %30 : vector<1x128xf32>
    %c0_17 = arith.constant 0 : index
    %c0_18 = arith.constant 0 : index
    %33 = vector.load %arg6[%c0_17, %c0_18] : memref<8x128xf32, #tpu.memory_space<vmem>>, vector<8x128xf32>
    %34 = vector.broadcast %32 : vector<1x128xf32> to vector<8x128xf32>
    %35 = arith.mulf %33, %34 : vector<8x128xf32>
    %c0_19 = arith.constant 0 : index
    %c0_20 = arith.constant 0 : index
    %36 = vector.load %arg7[%c0_19, %c0_20] : memref<128x256xf32, #tpu.memory_space<vmem>>, vector<128x256xf32>
    %cst_21 = arith.constant dense<0.000000e+00> : vector<8x256xf32>
    %37 = tpu.matmul %35, %36, %cst_21 {dimension_numbers = #tpu.dot_dimension_numbers<[1], [0], [0], [1], [0, 0, 1, 1], [], []>} : vector<8x128xf32>, vector<128x256xf32>, vector<8x256xf32> -> vector<8x256xf32>
    %c0_22 = arith.constant 0 : index
    %c0_23 = arith.constant 0 : index
    %38 = vector.load %arg8[%c0_22, %c0_23] : memref<8x256xf32, #tpu.memory_space<vmem>>, vector<8x256xf32>
    tpu.vector_store %arg8[%c0_22, %c0_23], %37 {strides = array<i32>} : memref<8x256xf32, #tpu.memory_space<vmem>>, vector<8x256xf32>,
    return
  }
  func.func @transform_0(%arg0: i32) -> (i32, i32, i32) {
    %c0_i32 = arith.constant 0 : i32
    %c0_i32_0 = arith.constant 0 : i32
    %c0_i32_1 = arith.constant 0 : i32
    return %arg0, %c0_i32, %c0_i32_0 : i32, i32, i32
  }
  func.func @transform_1(%arg0: i32) -> (i32, i32) {
    %c0_i32 = arith.constant 0 : i32
    %c0_i32_0 = arith.constant 0 : i32
    %c0_i32_1 = arith.constant 0 : i32
    return %c0_i32, %c0_i32_0 : i32, i32
  }
  func.func @transform_2(%arg0: i32) -> (i32, i32) {
    %c0_i32 = arith.constant 0 : i32
    %c0_i32_0 = arith.constant 0 : i32
    %c0_i32_1 = arith.constant 0 : i32
    return %c0_i32, %c0_i32_0 : i32, i32
  }
  func.func @transform_3(%arg0: i32) -> (i32, i32) {
    %c0_i32 = arith.constant 0 : i32
    %c0_i32_0 = arith.constant 0 : i32
    %c0_i32_1 = arith.constant 0 : i32
    return %c0_i32, %c0_i32_0 : i32, i32
  }
  func.func @transform_4(%arg0: i32) -> (i32, i32) {
    %c0_i32 = arith.constant 0 : i32
    %c0_i32_0 = arith.constant 0 : i32
    %c0_i32_1 = arith.constant 0 : i32
    return %c0_i32, %c0_i32_0 : i32, i32
  }
  func.func @transform_5(%arg0: i32) -> (i32, i32) {
    %c0_i32 = arith.constant 0 : i32
    %c0_i32_0 = arith.constant 0 : i32
    %c0_i32_1 = arith.constant 0 : i32
    return %c0_i32, %c0_i32_0 : i32, i32
  }
  func.func @transform_6(%arg0: i32) -> (i32, i32) {
    %c0_i32 = arith.constant 0 : i32
    %c0_i32_0 = arith.constant 0 : i32
    %c0_i32_1 = arith.constant 0 : i32
    return %c0_i32, %c0_i32_0 : i32, i32
  }
  func.func @transform_7(%arg0: i32) -> (i32, i32) {
    %c0_i32 = arith.constant 0 : i32
    %c0_i32_0 = arith.constant 0 : i32
    return %arg0, %c0_i32 : i32, i32
  }
}

</mosaic_0001>

<bundles_post_ra>
// kernel: depth_encoder_decoder_forward.1
= control target key start
LH: loop header
LB: loop body
LE: loop exit
PB: predicated region body
PF: predicated region fallthrough
CT: control target
= control target key end

     0   :  { %s817_s26 = smov 0   ;;  %s1046_s0 = inlined_call_operand.vmem [shape: bf16[2,48,128], index: 0, kind: input, shape index: {}]   ;;  %s1047_s1 = inlined_call_operand.vmem [shape: bf16[72,48], index: 1, kind: input, shape index: {}]   ;;  %s1048_s2 = inlined_call_operand.vmem [shape: f32[72,1], index: 2, kind: input, shape index: {}]   ;;  %s1049_s3 = inlined_call_operand.vmem [shape: bf16[1,64], index: 3, kind: input, shape index: {}]   ;;  %s1050_s4 = inlined_call_operand.<no memory space> [shape: f32[1,1], index: 4, kind: input, shape index: {}]   ;;  %s1051_s5 = inlined_call_operand.vmem [shape: f32[8,128], index: 5, kind: input, shape index: {}]   ;;  %s1052_s6 = inlined_call_operand.vmem [shape: f32[128,256], index: 6, kind: input, shape index: {}]   ;;  %s1053_s7 = inlined_call_operand.vmem [shape: f32[16,256], index: 7, kind: output, shape index: {}]  }
   0x1   :  { %v12_v0 = vstv %s1050_s4 }
   0x2   :  { %13 = vst [vmem:[#allocation2] sm:$0x1] %v12_v0 }
   0x3 LB: > { %s678_s27 = sadd.s32 4294967295, %s771_s26   ;;  %p682_p0 = scmp.ge.s32.totalorder %s771_s26, 1  ;;  %s771_s26 = sphi %s817_s26, %s19_s26  }
   0x4   : > { %p239_p1 = scmp.lt.s32.totalorder %s771_s26, 3 }
   0x6   : > { %p240_p2 = pnand %p682_p0, %p239_p1 }
   0x7   : > { %p271_p3 = scmp.lt.s32.totalorder (!%p240_p2), %s678_s27, 1 }
   0x8   : > { %243 = sbr.rel (%p240_p2) target bundleno = 486 (0x1e6), region = 48 }
   0xd   : > { %v303_v1 = vld [vmem:[%s1048_s2 + $0x30] sm:$0xff]  ;;  %v773_v2 = vmov 0   ;;  %v301_v3 = vld [vmem:[%s1048_s2 + $0x20] sm:$0xff]  ;;  %s1055_s27 = smov (!%p271_p3, %s678_s27), 1  ;;  %v304_v6 = vld [vmem:[%s1048_s2 + $0x38] sm:$0xff]  ;;  %vm392_vm0 = vcmask 392192  }
   0xe   : > { %746 = vset.pattern.permute.xlu0 %v773_v2  ;;  %747 = vset.pattern.permute.xlu1 %v773_v2  ;;  %s736_s8 = smul.u32 24, %s1055_s27  ;;  %v299_v4 = vld [vmem:[%s1048_s2 + $0x10] sm:$0xff]  ;;  %v302_v7 = vld [vmem:[%s1048_s2 + $0x28] sm:$0xff]  ;;  %v300_v9 = vld [vmem:[%s1048_s2 + $0x18] sm:$0xff]  ;;  %vm518_vm1 = vcmask 523264   ;;  %s722_s16 = sshll.u32 %s1055_s27, 4 }
   0xf   : > { %338 = vperm.xlu0 %746, %v303_v1   ;;  %328 = vperm.xlu1 %747, %v301_v3   ;;  %v297_v11 = vld [vmem:[%s1048_s2] sm:$0xff]  ;;  %v728_v13 = vld [vmem:[%s1047_s1 + $0x10] sm:$0xff]  ;;  %v298_v14 = vld [vmem:[%s1048_s2 + $0x8] sm:$0xff]  ;;  %s280_s19 = scalar_lea.vmem %s1053_s7, %s722_s16 }
  0x10   : > { %748 = vset.pattern.permute.xlu2 %v773_v2  ;;  %s275_s13 = scalar_lea.vmem %s1046_s0, %s736_s8  ;;  %v726_v12 = vld [vmem:[%s1047_s1] sm:$0xff]  ;;  %v729_v15 = vld [vmem:[%s1047_s1 + $0x18] sm:$0xff]  ;;  %v727_v20 = vld [vmem:[%s1047_s1 + $0x8] sm:$0xff] }
  0x11   : > { %318 = vperm.xlu2 %748, %v299_v4   ;;  %v725_v5 = vld [vmem:[%s275_s13 + $0x10] sm:$0xff]  ;;  %v724_v8 = vld [vmem:[%s275_s13 + $0x8] sm:$0xff]  ;;  %v723_v10 = vld [vmem:[%s275_s13] sm:$0xff] }
  0x12   : > { %413 = vmatpush.bf16.msra.mxu0 %v725_v5  ;;  %730 = vmatpush.bf16.msra.mxu1 %v725_v5  ;;  %v305_v16 = vld [vmem:[%s1048_s2 + $0x40] sm:$0xff] }
  0x13   : > { %731 = vmatpush.bf16.msra.mxu2 %v725_v5  ;;  %v536_v17 = vld [vmem:[#allocation2] sm:$0x1] }
  0x14   : > { %v296_v18 = vld [vmem:[%s1047_s1 + $0x20] sm:$0xf] }
  0x15   : > { %v368_v19 = vunpack.c.l.b16 %v296_v18  ;;  %v580_v18 = vld [vmem:[%s1052_s6 + $0xf8] sm:$0xff] }
  0x16   : > { %414 = vmatpush.bf16.msra.mxu0 %v724_v8  ;;  %732 = vmatpush.bf16.msra.mxu1 %v724_v8 }
  0x17   : > { %343 = vperm.xlu0 %746, %v304_v6   ;;  %333 = vperm.xlu1 %747, %v302_v7   ;;  %v373_v21 = vpack.c.b16 %v368_v19, %v368_v19  ;;  %v577_v19 = vld [vmem:[%s1052_s6 + $0xe0] sm:$0xff] }
  0x18   : > { %733 = vmatpush.bf16.msra.mxu2 %v724_v8  ;;  %601 = vmatpush.msra.mxu3 %v580_v18 }
  0x19   : > { %323 = vperm.xlu2 %748, %v300_v9  }
  0x1a   : > { %415 = vmatpush.bf16.msra.mxu0 %v723_v10  ;;  %734 = vmatpush.bf16.msra.mxu1 %v723_v10 }
  0x1c   : > { %735 = vmatpush.bf16.msra.mxu2 %v723_v10 }
  0x1d   : > { %714 = vmatmul.msk.bf16.vlgmr.msra.gmra.mxu0 %vm392_vm0, %v726_v12  ;;  %716 = vmatmul.msk.bf16.vlgmr.msra.gmra.mxu1 %vm392_vm0, %v728_v13 }
  0x1f   : > { %308 = vperm.xlu0 %746, %v297_v11   ;;  %313 = vperm.xlu1 %747, %v298_v14  }
  0x20   : > { %717 = vmatmul.msk.bf16.vlgmr.msra.gmra.mxu2 %vm392_vm0, %v729_v15 }
  0x21   : > { %348 = vperm.xlu2 %748, %v305_v16  }
  0x27   : > { %539 = vperm.xlu0 %746, %v536_v17   ;;  %v579_v17 = vld [vmem:[%s1052_s6 + $0xf0] sm:$0xff] }
  0x28   : > { %581 = vmatpush.msrb.mxu2 %v579_v17 }
  0x2a   : > { %582 = vmatpush.msrb.mxu2 %v577_v19  ;;  %v513_v19 = vld [vmem:[%s1049_s3] sm:$0x1] }
  0x2d   : > { %715 = vmatmul.msk.bf16.gmra.mxu0 %vm392_vm0, %v727_v20 }
  0x30   : > { %718 = vmatmul.msk.bf16.gmra.mxu2 %vm392_vm0, %v373_v21  ;;  %v578_v21 = vld [vmem:[%s1052_s6 + $0xe8] sm:$0xff] }
  0x31   : > { %602 = vmatpush.msra.mxu3 %v578_v21  ;;  %v558_v21 = vld [vmem:[%s1052_s6 + $0x48] sm:$0xff] }
  0x6b   : > { %v319_v46 = vpop.permute.xlu2 %318 }
  0x73   : > { %v324_v7 = vpop.permute.xlu2 %323 }
  0x81   : > { %v329_v22 = vpop.permute.xlu1 %328  ;;  %v339_v23 = vpop.permute.xlu0 %338 }
  0x89   : > { %v334_v24 = vpop.permute.xlu1 %333  ;;  %v344_v25 = vpop.permute.xlu0 %343 }
  0x91   : > { %v314_v30 = vpop.permute.xlu1 %313  ;;  %v309_v31 = vpop.permute.xlu0 %308 }
  0x9a   : > { %v417_v26 = vpop.f32.mrf.mxu0  ;;  %v427_v27 = vpop.f32.mrf.mxu1 }
  0x9b   : > { %v878_v28 = vadd.f32 %v427_v27, %v329_v22  ;;  %v889_v39 = vadd.f32 %v417_v26, %v309_v31 }
  0x9d   : > { %v445_v29 = vmul.f32 %v878_v28, %v878_v28  ;;  %v441_v47 = vmul.f32 %v889_v39, %v889_v39 }
  0x9f   : > { %v453_v36 = vmul.f32 %v445_v29, %v878_v28  ;;  %v449_v58 = vmul.f32 %v441_v47, %v889_v39 }
  0xa1   : > { %v461_v43 = vmul.f32 0.044715, %v453_v36  ;;  %v457_v3 = vmul.f32 0.044715, %v449_v58 }
  0xa2   : > { %v419_v34 = vpop.f32.mrf.mxu0  ;;  %v429_v35 = vpop.f32.mrf.mxu1 }
  0xa3   : > { %v432_v32 = vpop.f32.mrf.mxu2  ;;  %v885_v37 = vadd.f32 %v419_v34, %v314_v30  ;;  %v887_v38 = vadd.f32 %v429_v35, %v334_v24  ;;  %v469_v54 = vadd.f32 %v461_v43, %v878_v28  ;;  %v465_v13 = vadd.f32 %v457_v3, %v889_v39  ;;  %v575_v24 = vld [vmem:[%s1052_s6 + $0xd0] sm:$0xff]  ;;  %v574_v34 = vld [vmem:[%s1052_s6 + $0xc8] sm:$0xff] }
  0xa4   : > { %v882_v33 = vadd.f32 %v432_v32, %v339_v23  ;;  %v573_v32 = vld [vmem:[%s1052_s6 + $0xc0] sm:$0xff]  ;;  %583 = vmatpush.msrb.mxu2 %v575_v24 }
  0xa5   : > { %v446_v41 = vmul.f32 %v887_v38, %v887_v38  ;;  %v442_v44 = vmul.f32 %v885_v37, %v885_v37  ;;  %v477_v2 = vmul.f32 0.7978846, %v469_v54  ;;  %v473_v27 = vmul.f32 0.7978846, %v465_v13  ;;  %v567_v54 = vld [vmem:[%s1052_s6 + $0x90] sm:$0xff]  ;;  %v553_v24 = vld [vmem:[%s1052_s6 + $0x20] sm:$0xff] }
  0xa6   : > { %v447_v40 = vmul.f32 %v882_v33, %v882_v33  ;;  %584 = vmatpush.msrb.mxu2 %v573_v32  ;;  %v349_v32 = vpop.permute.xlu2 %348 }
  0xa7   : > { %v454_v45 = vmul.f32 %v446_v41, %v887_v38  ;;  %v450_v55 = vmul.f32 %v442_v44, %v885_v37  ;;  %v571_v41 = vld [vmem:[%s1052_s6 + $0xb0] sm:$0xff] }
  0xa8   : > { %v455_v42 = vmul.f32 %v447_v40, %v882_v33  ;;  %585 = vmatpush.msrb.mxu2 %v571_v41 }
  0xa9   : > { %v462_v49 = vmul.f32 0.044715, %v454_v45  ;;  %v458_v0 = vmul.f32 0.044715, %v450_v55  ;;  %v568_v55 = vld [vmem:[%s1052_s6 + $0x98] sm:$0xff] }
  0xaa   : > { %v463_v48 = vmul.f32 0.044715, %v455_v42  ;;  %v422_v53 = vpop.f32.mrf.mxu0  ;;  %v572_v42 = vld [vmem:[%s1052_s6 + $0xb8] sm:$0xff] }
  0xab   : > { %v434_v50 = vpop.f32.mrf.mxu2  ;;  %v470_v56 = vadd.f32 %v462_v49, %v887_v38  ;;  %v907_v57 = vadd.f32 %v422_v53, %v319_v46  ;;  %v466_v10 = vadd.f32 %v458_v0, %v885_v37  ;;  %v570_v49 = vld [vmem:[%s1052_s6 + $0xa8] sm:$0xff] }
  0xac   : > { %v471_v51 = vadd.f32 %v463_v48, %v882_v33  ;;  %v902_v52 = vadd.f32 %v434_v50, %v344_v25  ;;  %v576_v25 = vld [vmem:[%s1052_s6 + $0xd8] sm:$0xff]  ;;  %v569_v48 = vld [vmem:[%s1052_s6 + $0xa0] sm:$0xff] }
  0xad   : > { %v443_v61 = vmul.f32 %v907_v57, %v907_v57  ;;  %v478_v63 = vmul.f32 0.7978846, %v470_v56  ;;  %v474_v23 = vmul.f32 0.7978846, %v466_v10  ;;  %603 = vmatpush.msra.mxu3 %v576_v25  ;;  %586 = vmatpush.msrb.mxu2 %v569_v48  ;;  %v554_v25 = vld [vmem:[%s1052_s6 + $0x28] sm:$0xff] }
  0xae   : > { %v448_v59 = vmul.f32 %v902_v52, %v902_v52  ;;  %v479_v60 = vmul.f32 0.7978846, %v471_v51 }
  0xaf   : > { %v451_v1 = vmul.f32 %v443_v61, %v907_v57  ;;  %604 = vmatpush.msra.mxu3 %v574_v34  ;;  %v565_v61 = vld [vmem:[%s1052_s6 + $0x80] sm:$0xff]  ;;  %587 = vmatpush.msrb.mxu2 %v567_v54 }
  0xb0   : > { %v456_v62 = vmul.f32 %v448_v59, %v902_v52  ;;  %749 = vtanh.f32 %v479_v60 }
  0xb1   : > { %v459_v5 = vmul.f32 0.044715, %v451_v1  ;;  %751 = vtanh.f32 %v478_v63  ;;  %605 = vmatpush.msra.mxu3 %v572_v42  ;;  %588 = vmatpush.msrb.mxu2 %v565_v61 }
  0xb2   : > { %v464_v4 = vmul.f32 0.044715, %v456_v62  ;;  %v424_v9 = vpop.f32.mrf.mxu0  ;;  %753 = vtanh.f32 %v477_v2  ;;  %v566_v62 = vld [vmem:[%s1052_s6 + $0x88] sm:$0xff] }
  0xb3   : > { %v916_v6 = vpop.f32.mrf.mxu2  ;;  %v467_v11 = vadd.f32 %v459_v5, %v907_v57  ;;  %v921_v12 = vadd.f32 %v424_v9, %v324_v7  ;;  %606 = vmatpush.msra.mxu3 %v570_v49 }
  0xb4   : > { %v472_v8 = vadd.f32 %v464_v4, %v902_v52  ;;  %v438_v34 = vadd.f32 %v916_v6, %v349_v32 }
  0xb5   : > { %v444_v15 = vmul.f32 %v921_v12, %v921_v12  ;;  %v475_v16 = vmul.f32 0.7978846, %v467_v11  ;;  %607 = vmatpush.msra.mxu3 %v568_v55 }
  0xb6   : > { %v480_v14 = vmul.f32 0.7978846, %v472_v8  ;;  %v750_v20 = vpop.eup %749 }
  0xb7   : > { %v452_v22 = vmul.f32 %v444_v15, %v921_v12  ;;  %v752_v26 = vpop.eup %751  ;;  %v495_v31 = vadd.f32 1.0, %v750_v20  ;;  %608 = vmatpush.msra.mxu3 %v566_v62  ;;  %v557_v20 = vld [vmem:[%s1052_s6 + $0x40] sm:$0xff] }
  0xb8   : > { %755 = vtanh.f32 %v480_v14  ;;  %v754_v29 = vpop.eup %753  ;;  %v494_v40 = vadd.f32 1.0, %v752_v26  ;;  %v551_v26 = vld [vmem:[%s1052_s6 + $0x10] sm:$0xff] }
  0xb9   : > { %v460_v30 = vmul.f32 0.044715, %v452_v22  ;;  %757 = vtanh.f32 %v475_v16  ;;  %v493_v44 = vadd.f32 1.0, %v754_v29  ;;  %v503_v46 = vmul.f32 0.5, %v495_v31  ;;  %v555_v22 = vld [vmem:[%s1052_s6 + $0x30] sm:$0xff]  ;;  %v549_v29 = vld [vmem:[%s1052_s6] sm:$0xff]  ;;  %v540_v31 = vpop.permute.xlu0 %539 }
  0xba   : > { %759 = vtanh.f32 %v474_v23  ;;  %v502_v53 = vmul.f32 0.5, %v494_v40  ;;  %v556_v23 = vld [vmem:[%s1052_s6 + $0x38] sm:$0xff] }
  0xbb   : > { %v439_v35 = vpop.f32.mrf.mxu2  ;;  %v468_v36 = vadd.f32 %v460_v30, %v921_v12  ;;  %761 = vtanh.f32 %v473_v27  ;;  %v511_v58 = vmul.f32 %v503_v46, %v882_v33  ;;  %v501_v60 = vmul.f32 0.5, %v493_v44  ;;  %v563_v33 = vld [vmem:[%s1052_s6 + $0x70] sm:$0xff]  ;;  %v552_v27 = vld [vmem:[%s1052_s6 + $0x18] sm:$0xff]  ;;  %v550_v30 = vld [vmem:[%s1052_s6 + $0x8] sm:$0xff] }
  0xbc   : > { %v510_v2 = vmul.f32 %v502_v53, %v887_v38  ;;  %589 = vmatpush.msrb.mxu2 %v563_v33 }
  0xbd   : > { %v476_v47 = vmul.f32 0.7978846, %v468_v36  ;;  %v509_v5 = vmul.f32 %v501_v60, %v878_v28  ;;  %v542_v36 = vperm.slane %v540_v31, 0 }
  0xbe   : > { %v756_v43 = vpop.eup %755 }
  0xbf   : > { %v496_v45 = vadd.f32 1.0, %v756_v43  ;;  %v758_v50 = vpop.eup %757  ;;  %763 = vtanh.f32 %v476_v47  ;;  %v516_v38 = vpack.c.bf16 %v510_v2, %v509_v5 }
  0xc0   : > { %v760_v56 = vpop.eup %759  ;;  %v491_v63 = vadd.f32 1.0, %v758_v50 }
  0xc1   : > { %v504_v51 = vmul.f32 0.5, %v496_v45  ;;  %v762_v0 = vpop.eup %761  ;;  %v490_v3 = vadd.f32 1.0, %v760_v56  ;;  %v546_v45 = vld [vmem:[%s1051_s5] sm:$0xff] }
  0xc2   : > { %v499_v8 = vmul.f32 0.5, %v491_v63  ;;  %v489_v9 = vadd.f32 1.0, %v762_v0 }
  0xc3   : > { %v512_v59 = vmul.f32 %v504_v51, %v902_v52  ;;  %v564_v52 = vld [vmem:[%s1052_s6 + $0x78] sm:$0xff]  ;;  %v498_v11 = vmul.f32 0.5, %v490_v3 }
  0xc4   : > { %609 = vmatpush.msra.mxu3 %v564_v52  ;;  %v507_v13 = vmul.f32 %v499_v8, %v907_v57  ;;  %v497_v15 = vmul.f32 0.5, %v489_v9  ;;  %v561_v57 = vld [vmem:[%s1052_s6 + $0x60] sm:$0xff] }
  0xc5   : > { %v517_v1 = vpack.c.bf16 %v512_v59, %v511_v58  ;;  %v764_v4 = vpop.eup %763  ;;  %v506_v17 = vmul.f32 %v498_v11, %v885_v37  ;;  %590 = vmatpush.msrb.mxu2 %v561_v57  ;;  %v559_v37 = vld [vmem:[%s1052_s6 + $0x50] sm:$0xff] }
  0xc6   : > { %v492_v7 = vadd.f32 1.0, %v764_v4  ;;  %v505_v28 = vmul.f32 %v497_v15, %v889_v39  ;;  %v560_v39 = vld [vmem:[%s1052_s6 + $0x58] sm:$0xff] }
  0xc7   : > { %526 = vmatpush.bf16.msrb.mxu1 %v517_v1  ;;  %591 = vmatpush.msrb.mxu2 %v559_v37 }
  0xc8   : > { %v500_v10 = vmul.f32 0.5, %v492_v7  ;;  %v514_v18 = vpack.c.bf16 %v506_v17, %v505_v28 }
  0xc9   : > { %592 = vmatpush.msrb.mxu2 %v557_v20 }
  0xca   : > { %v508_v14 = vmul.f32 %v500_v10, %v921_v12  ;;  %v562_v12 = vld [vmem:[%s1052_s6 + $0x68] sm:$0xff] }
  0xcb   : > { %527 = vmatpush.bf16.msrb.mxu1 %v516_v38  ;;  %610 = vmatpush.msra.mxu3 %v562_v12 }
  0xcc   : > { %v515_v16 = vpack.c.bf16 %v508_v14, %v507_v13  ;;  %593 = vmatpush.msrb.mxu2 %v555_v22 }
  0xcd   : > { %611 = vmatpush.msra.mxu3 %v560_v39 }
  0xce   : > { %594 = vmatpush.msrb.mxu2 %v553_v24 }
  0xcf   : > { %528 = vmatpush.bf16.msrb.mxu1 %v515_v16  ;;  %612 = vmatpush.msra.mxu3 %v558_v21 }
  0xd0   : > { %595 = vmatpush.msrb.mxu2 %v551_v26 }
  0xd1   : > { %613 = vmatpush.msra.mxu3 %v556_v23 }
  0xd2   : > { %596 = vmatpush.msrb.mxu2 %v549_v29 }
  0xd3   : > { %529 = vmatpush.bf16.msrb.mxu1 %v514_v18  ;;  %614 = vmatpush.msra.mxu3 %v554_v25 }
  0xd5   : > { %615 = vmatpush.msra.mxu3 %v552_v27 }
  0xd6   : > { %719 = vmatmul.msk.bf16.vlgmr.msrb.gmra.mxu1 %vm518_vm1, %v513_v19 }
  0xd7   : > { %616 = vmatpush.msra.mxu3 %v550_v30 }
 0x153   : > { %v531_v35 = vpop.f32.mrf.mxu1 }
 0x154   : > { %v535_v40 = vadd.f32 %v531_v35, %v438_v34 }
 0x156   : > { %v543_v41 = vadd.f32 %v542_v36, %v535_v40 }
 0x158   : > { %v544_v42 = vmax.f32 %v543_v41, 0.001 }
 0x15a   : > { %v545_v43 = vmin.f32 %v544_v42, 10.0 }
 0x15b   : > { %v533_v44 = vpop.f32.mrf.mxu1 }
 0x15c   : > { %v547_v46 = vperm.slane %v545_v43, 0 }
 0x15e   : > { %v548_v47 = vmul.f32 %v547_v46, %v546_v45 }
 0x160   : > { %597 = vmatmul.f32.vlgmr.msrb.gmra.mxu2 %v548_v47  ;;  %617 = vmatmul.f32.vlgmr.msra.gmra.mxu3 %v548_v47 }
 0x1e3   : > { %v598_v6 = vpop.f32.mrf.mxu2  ;;  %v618_v48 = vpop.f32.mrf.mxu3 }
 0x1e4   : > { %621 = vst [vmem:[%s280_s19] sm:$0xff] %v598_v6 }
 0x1e5   : > { %622 = vst [vmem:[%s280_s19 + $0x8] sm:$0xff] %v618_v48 }
 0x1e6 PF: > { %s19_s26 = sadd.s32 1, %s771_s26  }
 0x1e7   : > { %p16_p4 = scmp.ge.s32.totalorder %s19_s26, 4  }
 0x1e9   :  { %18 = sbr.rel (!%p16_p4) target bundleno = 3 (0x3), region = 78 }

</bundles_post_ra>
